<compile_context>
chip_gen: v7x
topology: tpu7x:2x2x1
jax: 0.10.0
libtpu: 0.0.40
codegen_flags: <defaults>
</compile_context>

<pallas_src>
import jax
import jax.numpy as jnp
from jax.experimental import pallas as pl
from jax.experimental.pallas import tpu as pltpu


MU_SLAB_LANES = 128  # lane-dense width of the mu output slab


def _vae_kernel(x_ref, we_ref, be_ref, wlp_ref, blp_ref,
                wd1_ref, bd1_ref, wd2_ref, bd2_ref, eps_ref,
                logits_ref, mu_ref):
    z_dim = wd1_ref.shape[0]

    # encoder: Linear(input_dim, hidden_dim) + ReLU.
    # bf16 operands on the MXU, f32 accumulation; epilogue stays f32 on the VPU.
    h = jnp.dot(x_ref[...], we_ref[...], preferred_element_type=jnp.float32)
    h = jnp.maximum(h + be_ref[...], 0.0)

    # q = Normal(mu, scale); scale == mu (same Linear reused in the module).
    # w_l / b_l are zero-padded to 128 output lanes, so this matmul directly
    # produces a lane-dense (tile_b, 128) slab -> ONE full-width store.
    mu_slab = jnp.dot(h, wlp_ref[...],
                      preferred_element_type=jnp.float32) + blp_ref[...]
    mu_ref[...] = mu_slab
    mu = mu_slab[:, :z_dim]

    # rsample: z = mu + eps * scale  (eps ~ N(0,1) from the host; scale == mu).
    z = mu + eps_ref[...] * mu

    # decoder: Linear(z_dim, hidden_dim) + ReLU + Linear(hidden_dim, input_dim)
    h2 = jnp.dot(z, wd1_ref[...], preferred_element_type=jnp.float32)
    h2 = jnp.maximum(h2 + bd1_ref[...], 0.0)
    logits = jnp.dot(h2.astype(jnp.bfloat16), wd2_ref[...],
                     preferred_element_type=jnp.float32) + bd2_ref[...]

    # bf16 output stream halves the largest write.
    logits_ref[...] = logits.astype(logits_ref.dtype)


def _choose_tile_b(B, tile_b_max):
    """Largest tile that divides B (avoids any wrapper-side padding copy)."""
    if B <= tile_b_max:
        return B                        # single full-batch tile
    cap = (tile_b_max // 16) * 16       # sublane-friendly for bf16 blocks
    for t in range(cap, 0, -16):
        if B % t == 0:
            return t
    return None


def vae_forward(x_nchw, params, eps, *, tile_b_max=1024):
    """Fused, batch-tiled VAE forward Pallas kernel.

    Args:
      x_nchw: (B, C, H, W) input image batch.  Supply bf16 from upstream to
              avoid an extra cast pass (any float dtype is accepted).
      params: dict of pre-transposed weights/biases (see init_params).
      eps:    (B, z_dim) f32 standard-normal noise for the reparameterization.
      tile_b_max: max batch tile.  1024 is safe on v5e/v6e/v7x; 2048 is fine on
              v6e/v7x with the bf16 x/logits streams used here.

    Returns:
      dict with 'bernoulli_logits' (p, bf16), 'normal_loc'/'normal_scale' (q)
      and the sample 'z'.
    """
    B = x_nchw.shape[0]
    x = x_nchw.reshape(B, -1)                 # same as x.view(B, -1); free
    if x.dtype != jnp.bfloat16:
        # Prefer bf16 from the producer; this cast is a fallback, not the fast path.
        x = x.astype(jnp.bfloat16)
    input_dim = x.shape[1]
    hidden_dim = params["w_enc"].shape[1]
    z_dim = params["w_l"].shape[1]
    eps = eps.astype(jnp.float32)

    # Zero-pad the loc-layer weights to a lane-dense 128-wide output slab
    # (one-time, tiny: hidden_dim x 128 f32).
    w_l_pad = jnp.zeros((hidden_dim, MU_SLAB_LANES), jnp.float32)
    w_l_pad = w_l_pad.at[:, :z_dim].set(params["w_l"])
    b_l_pad = jnp.zeros((1, MU_SLAB_LANES), jnp.float32)
    b_l_pad = b_l_pad.at[:, :z_dim].set(params["b_l"])

    # Batch tiling without a wrapper-side pad copy.
    tile_b = _choose_tile_b(B, tile_b_max)
    if tile_b is None:
        # TODO(synk): handle the ragged last tile with a masked remainder tile
        # instead of this minimal padding fallback (only hit for awkward B).
        tile_b = (tile_b_max // 16) * 16
        B_pad = pl.cdiv(B, tile_b) * tile_b
        x = jnp.pad(x, ((0, B_pad - B), (0, 0)))
        eps = jnp.pad(eps, ((0, B_pad - B), (0, 0)))
    else:
        B_pad = B
    num_tiles = B_pad // tile_b

    out_shapes = (
        jax.ShapeDtypeStruct((B_pad, input_dim), jnp.bfloat16),      # logits
        jax.ShapeDtypeStruct((B_pad, MU_SLAB_LANES), jnp.float32),   # mu slab
    )

    grid_spec = pltpu.PrefetchScalarGridSpec(
        num_scalar_prefetch=0,
        grid=(num_tiles,),
        in_specs=[
            pl.BlockSpec((tile_b, input_dim), lambda i: (i, 0)),          # x (bf16, tiled)
            pl.BlockSpec((input_dim, hidden_dim), lambda i: (0, 0)),      # w_enc (resident)
            pl.BlockSpec((1, hidden_dim), lambda i: (0, 0)),              # b_enc
            pl.BlockSpec((hidden_dim, MU_SLAB_LANES), lambda i: (0, 0)),  # w_l (lane-padded)
            pl.BlockSpec((1, MU_SLAB_LANES), lambda i: (0, 0)),           # b_l (lane-padded)
            pl.BlockSpec((z_dim, hidden_dim), lambda i: (0, 0)),          # w_dec1
            pl.BlockSpec((1, hidden_dim), lambda i: (0, 0)),              # b_dec1
            pl.BlockSpec((hidden_dim, input_dim), lambda i: (0, 0)),      # w_dec2
            pl.BlockSpec((1, input_dim), lambda i: (0, 0)),               # b_dec2
            pl.BlockSpec((tile_b, z_dim), lambda i: (i, 0)),              # eps (tiled)
        ],
        out_specs=[
            pl.BlockSpec((tile_b, input_dim), lambda i: (i, 0)),          # logits (bf16)
            pl.BlockSpec((tile_b, MU_SLAB_LANES), lambda i: (i, 0)),      # mu slab (f32)
        ],
    )

    # Advisory cost: the two 1024-wide matmuls dominate; per-row HBM traffic is
    # x(bf16) + logits(bf16) + eps(f32) + mu slab(f32), plus resident weights.
    flops = 2 * B_pad * (input_dim * hidden_dim + hidden_dim * z_dim
                         + z_dim * hidden_dim + hidden_dim * input_dim)
    bytes_accessed = (
        B_pad * (input_dim * 2            # x bf16 read
                 + input_dim * 2          # logits bf16 write
                 + z_dim * 4              # eps f32 read
                 + MU_SLAB_LANES * 4)     # mu slab f32 write
        + 2 * input_dim * hidden_dim * 2                       # bf16 big weights
        + (hidden_dim * MU_SLAB_LANES + z_dim * hidden_dim) * 4  # f32 small weights
        + (hidden_dim + MU_SLAB_LANES + hidden_dim + input_dim) * 4)  # biases
    cost = pl.CostEstimate(flops=flops, transcendentals=0,
                           bytes_accessed=bytes_accessed)

    logits_pad, mu_pad = pl.pallas_call(
        _vae_kernel,
        out_shape=out_shapes,
        grid_spec=grid_spec,
        compiler_params=pltpu.CompilerParams(
            dimension_semantics=("parallel",),     # megacore split on v7x
            vmem_limit_bytes=48 * 1024 * 1024,     # > 16/32 MiB scoped defaults
        ),
        cost_estimate=cost,
    )(
        x,
        params["w_enc"], params["b_enc"],
        w_l_pad, b_l_pad,
        params["w_dec1"], params["b_dec1"],
        params["w_dec2"], params["b_dec2"],
        eps,
    )

    logits = logits_pad[:B]
    mu = mu_pad[:B, :z_dim]
    # z is recomputed here (96 B/row XLA op) instead of being stored from the
    # kernel -- identical to the in-kernel value since mu is stored in f32.
    z = mu + eps[:B] * mu

    return {
        "bernoulli_logits": logits,   # parameters of p = Bernoulli(logits=...)
        "normal_loc": mu,             # parameters of q = Normal(mu, scale)
        "normal_scale": mu,           # same layer reused in the module => scale == mu
        "z": z,
    }


def init_params(key, input_dim, hidden_dim, z_dim):
    """Deterministic init mirroring nn.Linear default U(-1/sqrt(in), 1/sqrt(in)).

    Weights are stored pre-transposed as (in, out); biases as (1, out).
    The two 1024-wide weights (encoder in, decoder out) are stored in bf16;
    accumulation stays f32 in the kernel.
    """
    def linear(k, fan_in, fan_out, w_dtype=jnp.float32):
        kw, kb = jax.random.split(k)
        bound = 1.0 / jnp.sqrt(fan_in)
        w = jax.random.uniform(kw, (fan_in, fan_out), jnp.float32, -bound, bound)
        b = jax.random.uniform(kb, (1, fan_out), jnp.float32, -bound, bound)
        return w.astype(w_dtype), b

    k_enc, k_l, k_d1, k_d2 = jax.random.split(key, 4)
    w_enc, b_enc = linear(k_enc, input_dim, hidden_dim, jnp.bfloat16)
    w_l, b_l = linear(k_l, hidden_dim, z_dim)
    w_dec1, b_dec1 = linear(k_d1, z_dim, hidden_dim)
    w_dec2, b_dec2 = linear(k_d2, hidden_dim, input_dim, jnp.bfloat16)
    return {
        "w_enc": w_enc, "b_enc": b_enc,
        "w_l": w_l, "b_l": b_l,
        "w_dec1": w_dec1, "b_dec1": b_dec1,
        "w_dec2": w_dec2, "b_dec2": b_dec2,
    }


if __name__ == "__main__":
    # Small shapes consistent with the module: image batch flattened to input_dim.
    B, C, H, W = 2, 4, 16, 16
    input_dim = C * H * W          # 1024
    hidden_dim = 32
    z_dim = 8

    key = jax.random.PRNGKey(0)
    k_x, k_p, k_eps = jax.random.split(key, 3)

    # x supplied in bf16 (the fast path: no wrapper-side cast pass).
    x = jax.random.uniform(k_x, (B, C, H, W), jnp.float32).astype(jnp.bfloat16)
    params = init_params(k_p, input_dim, hidden_dim, z_dim)
    eps = jax.random.normal(k_eps, (B, z_dim), jnp.float32)  # rsample noise

    out = vae_forward(x, params, eps)
    jax.block_until_ready(out)

    # Pure-JAX reference with the same bf16-operand / f32-accumulate matmuls.
    xf = x.reshape(B, -1)
    h_ref = jnp.maximum(
        jnp.dot(xf, params["w_enc"],
                preferred_element_type=jnp.float32) + params["b_enc"], 0.0)
    mu_ref = jnp.dot(h_ref, params["w_l"],
                     preferred_element_type=jnp.float32) + params["b_l"]
    z_ref = mu_ref + eps * mu_ref
    h2_ref = jnp.maximum(
        jnp.dot(z_ref, params["w_dec1"],
                preferred_element_type=jnp.float32) + params["b_dec1"], 0.0)
    logits_ref = jnp.dot(h2_ref.astype(jnp.bfloat16), params["w_dec2"],
                         preferred_element_type=jnp.float32) + params["b_dec2"]

    assert jnp.allclose(out["normal_loc"], mu_ref, atol=1e-3, rtol=1e-3)
    assert jnp.allclose(out["normal_scale"], mu_ref, atol=1e-3, rtol=1e-3)
    assert jnp.allclose(out["z"], z_ref, atol=1e-3, rtol=1e-3)
    assert out["bernoulli_logits"].dtype == jnp.bfloat16
    assert jnp.allclose(out["bernoulli_logits"].astype(jnp.float32),
                        logits_ref.astype(jnp.bfloat16).astype(jnp.float32),
                        atol=2e-2, rtol=2e-2)

    print("KERNEL_OK")
</pallas_src>

<mosaic_0001>
module attributes {stable_mosaic.version = 11 : i64} {
  func.func @_vae_kernel(%arg0: i32, %arg1: memref<2x1024xbf16, #tpu.memory_space<vmem>>, %arg2: memref<1024x32xbf16, #tpu.memory_space<vmem>>, %arg3: memref<1x32xf32, #tpu.memory_space<vmem>>, %arg4: memref<32x128xf32, #tpu.memory_space<vmem>>, %arg5: memref<1x128xf32, #tpu.memory_space<vmem>>, %arg6: memref<8x32xf32, #tpu.memory_space<vmem>>, %arg7: memref<1x32xf32, #tpu.memory_space<vmem>>, %arg8: memref<32x1024xbf16, #tpu.memory_space<vmem>>, %arg9: memref<1x1024xf32, #tpu.memory_space<vmem>>, %arg10: memref<2x8xf32, #tpu.memory_space<vmem>>, %arg11: memref<2x1024xbf16, #tpu.memory_space<vmem>>, %arg12: memref<2x128xf32, #tpu.memory_space<vmem>>) attributes {dimension_semantics = [#tpu.dimension_semantics<parallel>], iteration_bounds = array<i64: 1>, scalar_prefetch = 0 : i64, scratch_operands = 0 : i64, tpu.core_type = #tpu.core_type<tc>, window_params = [{transform_indices = @transform_0, window_bounds = array<i64: 2, 1024>}, {pipeline_mode = #tpu.pipeline_mode<synchronous>, transform_indices = @transform_1, window_bounds = array<i64: 1024, 32>}, {pipeline_mode = #tpu.pipeline_mode<synchronous>, transform_indices = @transform_2, window_bounds = array<i64: 1, 32>}, {pipeline_mode = #tpu.pipeline_mode<synchronous>, transform_indices = @transform_3, window_bounds = array<i64: 32, 128>}, {pipeline_mode = #tpu.pipeline_mode<synchronous>, transform_indices = @transform_4, window_bounds = array<i64: 1, 128>}, {pipeline_mode = #tpu.pipeline_mode<synchronous>, transform_indices = @transform_5, window_bounds = array<i64: 8, 32>}, {pipeline_mode = #tpu.pipeline_mode<synchronous>, transform_indices = @transform_6, window_bounds = array<i64: 1, 32>}, {pipeline_mode = #tpu.pipeline_mode<synchronous>, transform_indices = @transform_7, window_bounds = array<i64: 32, 1024>}, {pipeline_mode = #tpu.pipeline_mode<synchronous>, transform_indices = @transform_8, window_bounds = array<i64: 1, 1024>}, {transform_indices = @transform_9, window_bounds = array<i64: 2, 8>}, {transform_indices = @transform_10, window_bounds = array<i64: 2, 1024>}, {transform_indices = @transform_11, window_bounds = array<i64: 2, 128>}]} {
    %c0 = arith.constant 0 : index
    %c0_0 = arith.constant 0 : index
    %0 = vector.load %arg1[%c0, %c0_0] : memref<2x1024xbf16, #tpu.memory_space<vmem>>, vector<2x1024xbf16>
    %c0_1 = arith.constant 0 : index
    %c0_2 = arith.constant 0 : index
    %1 = vector.load %arg2[%c0_1, %c0_2] : memref<1024x32xbf16, #tpu.memory_space<vmem>>, vector<1024x32xbf16>
    %cst = arith.constant dense<0.000000e+00> : vector<2x32xf32>
    %2 = tpu.matmul %0, %1, %cst {dimension_numbers = #tpu.dot_dimension_numbers<[1], [0], [0], [1], [0, 0, 1, 1], [], []>} : vector<2x1024xbf16>, vector<1024x32xbf16>, vector<2x32xf32> -> vector<2x32xf32>
    %c0_3 = arith.constant 0 : index
    %c0_4 = arith.constant 0 : index
    %3 = vector.load %arg3[%c0_3, %c0_4] : memref<1x32xf32, #tpu.memory_space<vmem>>, vector<1x32xf32>
    %4 = vector.broadcast %3 : vector<1x32xf32> to vector<2x32xf32>
    %5 = arith.addf %2, %4 : vector<2x32xf32>
    %cst_5 = arith.constant 0.000000e+00 : f32
    %6 = vector.broadcast %cst_5 : f32 to vector<2x32xf32>
    %7 = arith.maximumf %5, %6 : vector<2x32xf32>
    %c0_6 = arith.constant 0 : index
    %c0_7 = arith.constant 0 : index
    %8 = vector.load %arg4[%c0_6, %c0_7] : memref<32x128xf32, #tpu.memory_space<vmem>>, vector<32x128xf32>
    %cst_8 = arith.constant dense<0.000000e+00> : vector<2x128xf32>
    %9 = tpu.matmul %7, %8, %cst_8 {dimension_numbers = #tpu.dot_dimension_numbers<[1], [0], [0], [1], [0, 0, 1, 1], [], []>} : vector<2x32xf32>, vector<32x128xf32>, vector<2x128xf32> -> vector<2x128xf32>
    %c0_9 = arith.constant 0 : index
    %c0_10 = arith.constant 0 : index
    %10 = vector.load %arg5[%c0_9, %c0_10] : memref<1x128xf32, #tpu.memory_space<vmem>>, vector<1x128xf32>
    %11 = vector.broadcast %10 : vector<1x128xf32> to vector<2x128xf32>
    %12 = arith.addf %9, %11 : vector<2x128xf32>
    %c0_11 = arith.constant 0 : index
    %c0_12 = arith.constant 0 : index
    %13 = vector.load %arg12[%c0_11, %c0_12] : memref<2x128xf32, #tpu.memory_space<vmem>>, vector<2x128xf32>
    tpu.vector_store %arg12[%c0_11, %c0_12], %12 {strides = array<i32>} : memref<2x128xf32, #tpu.memory_space<vmem>>, vector<2x128xf32>,
    %14 = vector.extract_strided_slice %12 {offsets = [0, 0], sizes = [2, 8], strides = [1, 1]} : vector<2x128xf32> to vector<2x8xf32>
    %c0_13 = arith.constant 0 : index
    %c0_14 = arith.constant 0 : index
    %15 = vector.load %arg10[%c0_13, %c0_14] : memref<2x8xf32, #tpu.memory_space<vmem>>, vector<2x8xf32>
    %16 = arith.mulf %15, %14 : vector<2x8xf32>
    %17 = arith.addf %14, %16 : vector<2x8xf32>
    %c0_15 = arith.constant 0 : index
    %c0_16 = arith.constant 0 : index
    %18 = vector.load %arg6[%c0_15, %c0_16] : memref<8x32xf32, #tpu.memory_space<vmem>>, vector<8x32xf32>
    %cst_17 = arith.constant dense<0.000000e+00> : vector<2x32xf32>
    %19 = tpu.matmul %17, %18, %cst_17 {dimension_numbers = #tpu.dot_dimension_numbers<[1], [0], [0], [1], [0, 0, 1, 1], [], []>} : vector<2x8xf32>, vector<8x32xf32>, vector<2x32xf32> -> vector<2x32xf32>
    %c0_18 = arith.constant 0 : index
    %c0_19 = arith.constant 0 : index
    %20 = vector.load %arg7[%c0_18, %c0_19] : memref<1x32xf32, #tpu.memory_space<vmem>>, vector<1x32xf32>
    %21 = vector.broadcast %20 : vector<1x32xf32> to vector<2x32xf32>
    %22 = arith.addf %19, %21 : vector<2x32xf32>
    %cst_20 = arith.constant 0.000000e+00 : f32
    %23 = vector.broadcast %cst_20 : f32 to vector<2x32xf32>
    %24 = arith.maximumf %22, %23 : vector<2x32xf32>
    %25 = arith.truncf %24 : vector<2x32xf32> to vector<2x32xbf16>
    %c0_21 = arith.constant 0 : index
    %c0_22 = arith.constant 0 : index
    %26 = vector.load %arg8[%c0_21, %c0_22] : memref<32x1024xbf16, #tpu.memory_space<vmem>>, vector<32x1024xbf16>
    %cst_23 = arith.constant dense<0.000000e+00> : vector<2x1024xf32>
    %27 = tpu.matmul %25, %26, %cst_23 {dimension_numbers = #tpu.dot_dimension_numbers<[1], [0], [0], [1], [0, 0, 1, 1], [], []>} : vector<2x32xbf16>, vector<32x1024xbf16>, vector<2x1024xf32> -> vector<2x1024xf32>
    %c0_24 = arith.constant 0 : index
    %c0_25 = arith.constant 0 : index
    %28 = vector.load %arg9[%c0_24, %c0_25] : memref<1x1024xf32, #tpu.memory_space<vmem>>, vector<1x1024xf32>
    %29 = vector.broadcast %28 : vector<1x1024xf32> to vector<2x1024xf32>
    %30 = arith.addf %27, %29 : vector<2x1024xf32>
    %31 = arith.truncf %30 : vector<2x1024xf32> to vector<2x1024xbf16>
    %c0_26 = arith.constant 0 : index
    %c0_27 = arith.constant 0 : index
    %32 = vector.load %arg11[%c0_26, %c0_27] : memref<2x1024xbf16, #tpu.memory_space<vmem>>, vector<2x1024xbf16>
    tpu.vector_store %arg11[%c0_26, %c0_27], %31 {strides = array<i32>} : memref<2x1024xbf16, #tpu.memory_space<vmem>>, vector<2x1024xbf16>,
    return
  }
  func.func @transform_0(%arg0: i32) -> (i32, i32) {
    %c0_i32 = arith.constant 0 : i32
    %c0_i32_0 = arith.constant 0 : i32
    return %arg0, %c0_i32 : i32, i32
  }
  func.func @transform_1(%arg0: i32) -> (i32, i32) {
    %c0_i32 = arith.constant 0 : i32
    %c0_i32_0 = arith.constant 0 : i32
    %c0_i32_1 = arith.constant 0 : i32
    return %c0_i32, %c0_i32_0 : i32, i32
  }
  func.func @transform_2(%arg0: i32) -> (i32, i32) {
    %c0_i32 = arith.constant 0 : i32
    %c0_i32_0 = arith.constant 0 : i32
    %c0_i32_1 = arith.constant 0 : i32
    return %c0_i32, %c0_i32_0 : i32, i32
  }
  func.func @transform_3(%arg0: i32) -> (i32, i32) {
    %c0_i32 = arith.constant 0 : i32
    %c0_i32_0 = arith.constant 0 : i32
    %c0_i32_1 = arith.constant 0 : i32
    return %c0_i32, %c0_i32_0 : i32, i32
  }
  func.func @transform_4(%arg0: i32) -> (i32, i32) {
    %c0_i32 = arith.constant 0 : i32
    %c0_i32_0 = arith.constant 0 : i32
    %c0_i32_1 = arith.constant 0 : i32
    return %c0_i32, %c0_i32_0 : i32, i32
  }
  func.func @transform_5(%arg0: i32) -> (i32, i32) {
    %c0_i32 = arith.constant 0 : i32
    %c0_i32_0 = arith.constant 0 : i32
    %c0_i32_1 = arith.constant 0 : i32
    return %c0_i32, %c0_i32_0 : i32, i32
  }
  func.func @transform_6(%arg0: i32) -> (i32, i32) {
    %c0_i32 = arith.constant 0 : i32
    %c0_i32_0 = arith.constant 0 : i32
    %c0_i32_1 = arith.constant 0 : i32
    return %c0_i32, %c0_i32_0 : i32, i32
  }
  func.func @transform_7(%arg0: i32) -> (i32, i32) {
    %c0_i32 = arith.constant 0 : i32
    %c0_i32_0 = arith.constant 0 : i32
    %c0_i32_1 = arith.constant 0 : i32
    return %c0_i32, %c0_i32_0 : i32, i32
  }
  func.func @transform_8(%arg0: i32) -> (i32, i32) {
    %c0_i32 = arith.constant 0 : i32
    %c0_i32_0 = arith.constant 0 : i32
    %c0_i32_1 = arith.constant 0 : i32
    return %c0_i32, %c0_i32_0 : i32, i32
  }
  func.func @transform_9(%arg0: i32) -> (i32, i32) {
    %c0_i32 = arith.constant 0 : i32
    %c0_i32_0 = arith.constant 0 : i32
    return %arg0, %c0_i32 : i32, i32
  }
  func.func @transform_10(%arg0: i32) -> (i32, i32) {
    %c0_i32 = arith.constant 0 : i32
    %c0_i32_0 = arith.constant 0 : i32
    return %arg0, %c0_i32 : i32, i32
  }
  func.func @transform_11(%arg0: i32) -> (i32, i32) {
    %c0_i32 = arith.constant 0 : i32
    %c0_i32_0 = arith.constant 0 : i32
    return %arg0, %c0_i32 : i32, i32
  }
}

</mosaic_0001>

<bundles_post_ra>
// kernel: tpu_custom_call.1
= control target key start
LH: loop header
LB: loop body
LE: loop exit
PB: predicated region body
PF: predicated region fallthrough
CT: control target
= control target key end

     0   :  { %17 = vsyncpa [#allocation3], 0  ;;  %v181_v28 = vlaneseq  ;;  %v1682_v36 = vmov 1966171168   ;;  %s2081_s0 = inlined_call_operand.vmem [shape: bf16[2,1024], index: 0, kind: input, shape index: {}]   ;;  %s2082_s1 = inlined_call_operand.vmem [shape: bf16[1024,32], index: 1, kind: input, shape index: {}]   ;;  %s2083_s2 = inlined_call_operand.vmem [shape: f32[1,32], index: 2, kind: input, shape index: {}]   ;;  %s2084_s3 = inlined_call_operand.vmem [shape: f32[32,128], index: 3, kind: input, shape index: {}]   ;;  %s2085_s4 = inlined_call_operand.vmem [shape: f32[1,128], index: 4, kind: input, shape index: {}]   ;;  %s2086_s5 = inlined_call_operand.vmem [shape: f32[8,32], index: 5, kind: input, shape index: {}]   ;;  %s2087_s6 = inlined_call_operand.vmem [shape: f32[1,32], index: 6, kind: input, shape index: {}]   ;;  %s2088_s7 = inlined_call_operand.vmem [shape: bf16[32,1024], index: 7, kind: input, shape index: {}]   ;;  %s2089_s8 = inlined_call_operand.vmem [shape: f32[1,1024], index: 8, kind: input, shape index: {}]   ;;  %s2090_s9 = inlined_call_operand.vmem [shape: f32[2,8], index: 9, kind: input, shape index: {}]   ;;  %s2091_s10 = inlined_call_operand.hbm [shape: bf16[2,1024], index: 10, kind: output, shape index: {0}]   ;;  %s2092_s11 = inlined_call_operand.hbm [shape: f32[2,128], index: 11, kind: output, shape index: {1}]  }
   0x1   :  { %v1569_v0 = vld [vmem:[%s2082_s1 + $0x40] sm:$0xff]   ;;  %v1573_v4 = vld [vmem:[%s2082_s1 + $0x48] sm:$0xff]   ;;  %v1577_v8 = vld [vmem:[%s2082_s1 + $0x50] sm:$0xff]   ;;  %v179_v37 = vunpack.c.l.s4 %v1682_v36 }
   0x2   :  { %v1570_v1 = vld [vmem:[%s2082_s1 + $0xc0] sm:$0xff]   ;;  %1445 = vmatprep.subr.bf16.mxu0 %v1569_v0  ;;  %v1574_v5 = vld [vmem:[%s2082_s1 + $0xc8] sm:$0xff]   ;;  %v1578_v9 = vld [vmem:[%s2082_s1 + $0xd0] sm:$0xff]   ;;  %v1845_v33 = vshrl.u32 %v181_v28, 7 }
   0x3   :  { %v1571_v2 = vld [vmem:[%s2082_s1] sm:$0xff]   ;;  %1467 = vmatprep.subr.bf16.mxu1 %v1570_v1  ;;  %v1575_v6 = vld [vmem:[%s2082_s1 + $0x8] sm:$0xff]   ;;  %v1579_v10 = vld [vmem:[%s2082_s1 + $0x10] sm:$0xff]   ;;  %v180_v40 = vunpack.c.0.s8 %v179_v37 }
   0x4   :  { %v1572_v3 = vld [vmem:[%s2082_s1 + $0x80] sm:$0xff]   ;;  %1446 = vmatpush3.bf16.msra.mxu0 %v1571_v2  ;;  %v1576_v7 = vld [vmem:[%s2082_s1 + $0x88] sm:$0xff]   ;;  %v1580_v11 = vld [vmem:[%s2082_s1 + $0x90] sm:$0xff]  }
   0x5   :  { %1468 = vmatpush3.bf16.msra.mxu1 %v1572_v3  ;;  %1447 = vmatprep.subr.bf16.mxu0 %v1573_v4  ;;  %v1581_v12 = vld [vmem:[%s2082_s1 + $0x58] sm:$0xff]   ;;  %v1585_v16 = vld [vmem:[%s2082_s1 + $0x60] sm:$0xff]   ;;  %v1589_v20 = vld [vmem:[%s2082_s1 + $0x68] sm:$0xff]   ;;  %v1857_v41 = vsub.s32 %v180_v40, %v1845_v33 }
   0x6   :  { %1469 = vmatprep.subr.bf16.mxu1 %v1574_v5  ;;  %v1582_v13 = vld [vmem:[%s2082_s1 + $0xd8] sm:$0xff]   ;;  %v1586_v17 = vld [vmem:[%s2082_s1 + $0xe0] sm:$0xff]   ;;  %v1590_v21 = vld [vmem:[%s2082_s1 + $0xe8] sm:$0xff]  }
   0x7   :  { %v1583_v14 = vld [vmem:[%s2082_s1 + $0x18] sm:$0xff]   ;;  %v1587_v18 = vld [vmem:[%s2082_s1 + $0x20] sm:$0xff]   ;;  %v1591_v22 = vld [vmem:[%s2082_s1 + $0x28] sm:$0xff]  }
   0x8   :  { %1448 = vmatpush3.bf16.msra.mxu0 %v1575_v6  ;;  %v1584_v15 = vld [vmem:[%s2082_s1 + $0x98] sm:$0xff]   ;;  %v1588_v19 = vld [vmem:[%s2082_s1 + $0xa0] sm:$0xff]   ;;  %v1592_v23 = vld [vmem:[%s2082_s1 + $0xa8] sm:$0xff]  }
   0x9   :  { %1470 = vmatpush3.bf16.msra.mxu1 %v1576_v7  ;;  %1449 = vmatprep.subr.bf16.mxu0 %v1577_v8  ;;  %v1593_v24 = vld [vmem:[%s2082_s1 + $0x70] sm:$0xff]   ;;  %v1597_v29 = vld [vmem:[%s2082_s1 + $0x78] sm:$0xff]   ;;  %v40_v34 = vld [vmem:[%s2081_s0] sm:$0xff] }
   0xa   :  { %1471 = vmatprep.subr.bf16.mxu1 %v1578_v9  ;;  %v1594_v25 = vld [vmem:[%s2082_s1 + $0xf0] sm:$0xff]   ;;  %v1598_v30 = vld [vmem:[%s2082_s1 + $0xf8] sm:$0xff]   ;;  %v1602_v35 = vld [vmem:[%s2082_s1 + $0x140] sm:$0xff]   ;;  %v177_v39 = vcombine.high %v40_v34, %v40_v34  ;;  %v184_v42 = vrot.slane %v40_v34, %v1857_v41 }
   0xb   :  { %v1595_v26 = vld [vmem:[%s2082_s1 + $0x30] sm:$0xff]   ;;  %v1599_v31 = vld [vmem:[%s2082_s1 + $0x38] sm:$0xff]   ;;  %v1603_v38 = vld [vmem:[%s2082_s1 + $0x1c0] sm:$0xff]  }
   0xc   :  { %1450 = vmatpush3.bf16.msra.mxu0 %v1579_v10  ;;  %v1596_v27 = vld [vmem:[%s2082_s1 + $0xb0] sm:$0xff]   ;;  %v1600_v32 = vld [vmem:[%s2082_s1 + $0xb8] sm:$0xff]   ;;  %v1861_v43 = vrot.slane %v177_v39, %v1857_v41  ;;  %v192_v44 = vcombine.high %v184_v42, %v184_v42  ;;  %v200_v45 = vrot.slane %v184_v42, %v1857_v41  ;;  %v1604_v48 = vld [vmem:[%s2082_s1 + $0x100] sm:$0xff]  }
   0xd   :  { %1472 = vmatpush3.bf16.msra.mxu1 %v1580_v11  ;;  %1451 = vmatprep.subr.bf16.mxu0 %v1581_v12  ;;  %v1606_v51 = vld [vmem:[%s2082_s1 + $0x148] sm:$0xff]   ;;  %v1605_v53 = vld [vmem:[%s2082_s1 + $0x180] sm:$0xff]   ;;  %v1610_v57 = vld [vmem:[%s2082_s1 + $0x150] sm:$0xff]  }
   0xe   :  { %1473 = vmatprep.subr.bf16.mxu1 %v1582_v13  ;;  %v193_v46 = vcombine.high %v1861_v43, %v1861_v43  ;;  %v214_v47 = vrot.slane %v192_v44, %v1857_v41  ;;  %v222_v50 = vcombine.high %v200_v45, %v200_v45  ;;  %v1607_v54 = vld [vmem:[%s2082_s1 + $0x1c8] sm:$0xff]   ;;  %v1611_v59 = vld [vmem:[%s2082_s1 + $0x1d0] sm:$0xff]   ;;  %v1614_v61 = vld [vmem:[%s2082_s1 + $0x158] sm:$0xff]  }
   0xf   :  { %v1608_v56 = vld [vmem:[%s2082_s1 + $0x108] sm:$0xff]   ;;  %v1612_v60 = vld [vmem:[%s2082_s1 + $0x110] sm:$0xff]   ;;  %v1615_v63 = vld [vmem:[%s2082_s1 + $0x1d8] sm:$0xff]  }
  0x10   :  { %1452 = vmatpush3.bf16.msra.mxu0 %v1583_v14  ;;  %v221_v49 = vrot.slane %v193_v46, %v1857_v41  ;;  %650 = vmatprep.mubr.bf16.mxu0 %v214_v47  ;;  %v224_v52 = vcombine.high %v214_v47, %v214_v47  ;;  %v1609_v58 = vld [vmem:[%s2082_s1 + $0x188] sm:$0xff]   ;;  %v1613_v62 = vld [vmem:[%s2082_s1 + $0x190] sm:$0xff]   ;;  %v1616_v0 = vld [vmem:[%s2082_s1 + $0x118] sm:$0xff]  }
  0x11   :  { %1474 = vmatpush3.bf16.msra.mxu1 %v1584_v15  ;;  %1453 = vmatprep.subr.bf16.mxu0 %v1585_v16  ;;  %v1618_v1 = vld [vmem:[%s2082_s1 + $0x160] sm:$0xff]   ;;  %v1617_v2 = vld [vmem:[%s2082_s1 + $0x198] sm:$0xff]   ;;  %v1622_v5 = vld [vmem:[%s2082_s1 + $0x168] sm:$0xff]  }
  0x12   :  { %1475 = vmatprep.subr.bf16.mxu1 %v1586_v17  ;;  %v225_v55 = vcombine.high %v221_v49, %v221_v49  ;;  %690 = vmatprep.mubr.bf16.mxu1 %v224_v52  ;;  %v1619_v3 = vld [vmem:[%s2082_s1 + $0x1e0] sm:$0xff]   ;;  %v1623_v7 = vld [vmem:[%s2082_s1 + $0x1e8] sm:$0xff]   ;;  %v1626_v9 = vld [vmem:[%s2082_s1 + $0x170] sm:$0xff]  }
  0x13   :  { %v1620_v4 = vld [vmem:[%s2082_s1 + $0x120] sm:$0xff]   ;;  %v1624_v8 = vld [vmem:[%s2082_s1 + $0x128] sm:$0xff]  }
  0x14   :  { %1454 = vmatpush3.bf16.msra.mxu0 %v1587_v18  ;;  %v1621_v6 = vld [vmem:[%s2082_s1 + $0x1a0] sm:$0xff]  }
  0x15   :  { %1476 = vmatpush3.bf16.msra.mxu1 %v1588_v19  ;;  %1455 = vmatprep.subr.bf16.mxu0 %v1589_v20 }
  0x16   :  { %1477 = vmatprep.subr.bf16.mxu1 %v1590_v21 }
  0x18   :  { %1456 = vmatpush3.bf16.msra.mxu0 %v1591_v22 }
  0x19   :  { %1478 = vmatpush3.bf16.msra.mxu1 %v1592_v23  ;;  %1457 = vmatprep.subr.bf16.mxu0 %v1593_v24 }
  0x1a   :  { %1479 = vmatprep.subr.bf16.mxu1 %v1594_v25 }
  0x1c   :  { %1458 = vmatpush3.bf16.msra.mxu0 %v1595_v26 }
  0x1d   :  { %1480 = vmatpush3.bf16.msra.mxu1 %v1596_v27  ;;  %1459 = vmatprep.subr.bf16.mxu0 %v1597_v29 }
  0x1e   :  { %1481 = vmatprep.subr.bf16.mxu1 %v1598_v30 }
  0x20   :  { %1460 = vmatpush3.bf16.msra.mxu0 %v1599_v31 }
  0x21   :  { %1482 = vmatpush3.bf16.msra.mxu1 %v1600_v32  ;;  %1489 = vmatprep.subr.bf16.mxu0 %v1602_v35 }
  0x22   :  { %1511 = vmatprep.subr.bf16.mxu1 %v1603_v38 }
  0x23   :  { %651 = vmatmul.mubr.bf16.vlgmr.msra.gmra.mrb[0].mxu0 %v200_v45 }
  0x24   :  { %1490 = vmatpush3.bf16.msra.mxu0 %v1604_v48  ;;  %691 = vmatmul.mubr.bf16.vlgmr.msra.gmra.mrb[0].mxu1 %v222_v50 }
  0x25   :  { %1491 = vmatprep.subr.bf16.mxu0 %v1606_v51  ;;  %1512 = vmatpush3.bf16.msra.mxu1 %v1605_v53 }
  0x26   :  { %730 = vmatprep.mubr.bf16.mxu0 %v221_v49  ;;  %1513 = vmatprep.subr.bf16.mxu1 %v1607_v54 }
  0x27   :  { %770 = vmatprep.mubr.bf16.mxu1 %v225_v55 }
  0x28   :  { %1492 = vmatpush3.bf16.msra.mxu0 %v1608_v56 }
  0x29   :  { %1493 = vmatprep.subr.bf16.mxu0 %v1610_v57  ;;  %1514 = vmatpush3.bf16.msra.mxu1 %v1609_v58 }
  0x2a   :  { %1515 = vmatprep.subr.bf16.mxu1 %v1611_v59 }
  0x2c   :  { %1494 = vmatpush3.bf16.msra.mxu0 %v1612_v60 }
  0x2d   :  { %1495 = vmatprep.subr.bf16.mxu0 %v1614_v61  ;;  %1516 = vmatpush3.bf16.msra.mxu1 %v1613_v62 }
  0x2e   :  { %1517 = vmatprep.subr.bf16.mxu1 %v1615_v63 }
  0x30   :  { %1496 = vmatpush3.bf16.msra.mxu0 %v1616_v0 }
  0x31   :  { %1497 = vmatprep.subr.bf16.mxu0 %v1618_v1  ;;  %1518 = vmatpush3.bf16.msra.mxu1 %v1617_v2 }
  0x32   :  { %1519 = vmatprep.subr.bf16.mxu1 %v1619_v3 }
  0x34   :  { %1498 = vmatpush3.bf16.msra.mxu0 %v1620_v4 }
  0x35   :  { %1499 = vmatprep.subr.bf16.mxu0 %v1622_v5 }
  0x36   :  { %18 = vsyncpa [#allocation5], 0  ;;  %1520 = vmatpush3.bf16.msra.mxu1 %v1621_v6  ;;  %v1625_v10 = vld [vmem:[%s2082_s1 + $0x1a8] sm:$0xff]   ;;  %v1627_v11 = vld [vmem:[%s2082_s1 + $0x1f0] sm:$0xff]   ;;  %v207_v17 = vrot.slane %v1861_v43, %v1857_v41  ;;  %v1683_v23 = vmov 0.0|0.0   ;;  %vm1684_vm0 = vmmov 0  }
  0x37   :  { %1521 = vmatprep.subr.bf16.mxu1 %v1623_v7  ;;  %v1628_v12 = vld [vmem:[%s2082_s1 + $0x130] sm:$0xff]   ;;  %v1630_v13 = vld [vmem:[%s2082_s1 + $0x178] sm:$0xff]   ;;  %v779_v20 = vld [vmem:[%s2084_s3] sm:$0xff]  ;;  %v1685_v27 = vmov 0.0   ;;  %vm790_vm1 = vcmask 261120   ;;  %vm876_vm2 = vcmask 64512  }
  0x38   :  { %1500 = vmatpush3.bf16.msra.mxu0 %v1624_v8  ;;  %v1629_v14 = vld [vmem:[%s2082_s1 + $0x1b0] sm:$0xff]   ;;  %v1631_v15 = vld [vmem:[%s2082_s1 + $0x1f8] sm:$0xff]   ;;  %v223_v19 = vcombine.high %v207_v17, %v207_v17  ;;  %v780_v21 = vld [vmem:[%s2084_s3 + $0x8] sm:$0xff] }
  0x39   :  { %1501 = vmatprep.subr.bf16.mxu0 %v1626_v9  ;;  %v1632_v16 = vld [vmem:[%s2082_s1 + $0x138] sm:$0xff]   ;;  %v1557_v22 = vpack.c.bf16 %v780_v21, %v779_v20  ;;  %v781_v24 = vld [vmem:[%s2084_s3 + $0x10] sm:$0xff]  ;;  %v868_v28 = vld [vmem:[%s2086_s5] sm:$0xff] }
  0x3a   :  { %1522 = vmatpush3.bf16.msra.mxu1 %v1625_v10  ;;  %v1633_v18 = vld [vmem:[%s2082_s1 + $0x1b8] sm:$0xff]   ;;  %v1352_v30 = vld [vmem:[%s2083_s2] ss:$0 sm:$0xff]  ;;  %v953_v59 = vld [vmem:[%s2088_s7 + $0x8] sm:$0xff] }
  0x3b   :  { %1523 = vmatprep.subr.bf16.mxu1 %v1627_v11  ;;  %v782_v25 = vld [vmem:[%s2084_s3 + $0x18] sm:$0xff]  ;;  %v952_v57 = vld [vmem:[%s2088_s7] sm:$0xff]  ;;  %v957_v62 = vld [vmem:[%s2088_s7 + $0x28] sm:$0xff] }
  0x3c   :  { %1502 = vmatpush3.bf16.msra.mxu0 %v1628_v12  ;;  %v1560_v26 = vpack.c.bf16 %v782_v25, %v781_v24  ;;  %v956_v58 = vld [vmem:[%s2088_s7 + $0x20] sm:$0xff]  ;;  %v1423_v63 = vcombine.low %v953_v59, %v957_v62  ;;  %v1424_v0 = vcombine.high %v953_v59, %v957_v62  ;;  %v961_v10 = vld [vmem:[%s2088_s7 + $0x48] sm:$0xff]  ;;  %v959_v21 = vld [vmem:[%s2088_s7 + $0x38] sm:$0xff] }
  0x3d   :  { %1503 = vmatprep.subr.bf16.mxu0 %v1630_v13  ;;  %v1421_v60 = vcombine.low %v952_v57, %v956_v58  ;;  %v1422_v61 = vcombine.high %v952_v57, %v956_v58  ;;  %v1417_v1 = vld [vmem:[%s2085_s4] ss:$0 sm:$0xff]  ;;  %v965_v12 = vld [vmem:[%s2088_s7 + $0x68] sm:$0xff] }
  0x3e   :  { %1524 = vmatpush3.bf16.msra.mxu1 %v1629_v14  ;;  %v865_v3 = vld [vmem:[%s2090_s9] sm:$0x3]  ;;  %v1431_v14 = vcombine.low %v961_v10, %v965_v12 }
  0x3f   :  { %1525 = vmatprep.subr.bf16.mxu1 %v1631_v15  ;;  %v960_v8 = vld [vmem:[%s2088_s7 + $0x40] sm:$0xff]  ;;  %v1432_v15 = vcombine.high %v961_v10, %v965_v12 }
  0x40   :  { %1504 = vmatpush3.bf16.msra.mxu0 %v1632_v16  ;;  %v964_v9 = vld [vmem:[%s2088_s7 + $0x60] sm:$0xff]  ;;  %v954_v16 = vld [vmem:[%s2088_s7 + $0x10] sm:$0xff] }
  0x41   :  { %1556 = vmatprep.subr.bf16.mxu0 %v1683_v23  ;;  %v1430_v11 = vcombine.high %v960_v8, %v964_v9  ;;  %v1429_v13 = vcombine.low %v960_v8, %v964_v9  ;;  %v1419_v25 = vld [vmem:[%s2087_s6] ss:$0 sm:$0xff]  ;;  %s1687_s6 = smov [#allocation4]  }
  0x42   :  { %1526 = vmatpush3.bf16.msra.mxu1 %v1633_v18  ;;  %v955_v18 = vld [vmem:[%s2088_s7 + $0x18] sm:$0xff] }
  0x43   :  { %731 = vmatmul.mubr.bf16.vlgmr.msra.gmra.mrb[4].mxu0 %v207_v17  ;;  %1551 = vmatprep.subr.mxu1 %v1685_v27  ;;  %v958_v17 = vld [vmem:[%s2088_s7 + $0x30] sm:$0xff]  ;;  %v1428_v24 = vcombine.high %v955_v18, %v959_v21 }
  0x44   :  { %1558 = vmatpush3.bf16.msra.mxu0 %v1557_v22  ;;  %1548 = vmatprep.mubr.msk.f32.mxu0 %vm1684_vm0, %v1685_v27  ;;  %v1426_v20 = vcombine.high %v954_v16, %v958_v17  ;;  %v1686_v22 = vmov 0  }
  0x45   :  { %771 = vmatmul.mubr.bf16.vlgmr.msra.gmra.mrb[4].mxu1 %v223_v19  ;;  %1559 = vmatprep.subr.bf16.mxu0 %v1683_v23  ;;  %v1425_v19 = vcombine.low %v954_v16, %v958_v17  ;;  %v1427_v23 = vcombine.low %v955_v18, %v959_v21 }
  0x46   :  { %1553 = vmatprep.mubr.msk.f32.mxu1 %vm1684_vm0, %v1685_v27  ;;  %1552 = vmatpush3.msra.mxu1 %v868_v28 }
  0x47   :  { %1134 = vmatprep.subr.bf16.mxu1 %v1424_v0 }
  0x48   :  { %1561 = vmatpush3.bf16.msra.mxu0 %v1560_v26 }
  0x49   :  { %1093 = vmatprep.subr.bf16.mxu0 %v1422_v61 }
  0xf6   :  { %v1461_v29 = vpop.f32.mrb[0].mxu0 }
  0xf7   :  { %v1462_v31 = vpop.f32.mrb[1].mxu0  ;;  %v1483_v32 = vpop.f32.mrb[0].mxu1 }
  0xf8   :  { %v1463_v34 = vadd.f32 %v1462_v31, %v1461_v29  ;;  %v1464_v35 = vpop.f32.mrb[2].mxu0  ;;  %v1484_v36 = vpop.f32.mrb[1].mxu1  ;;  %v962_v29 = vld [vmem:[%s2088_s7 + $0x50] sm:$0xff]  ;;  %v963_v31 = vld [vmem:[%s2088_s7 + $0x58] sm:$0xff] }
  0xf9   :  { %v1465_v37 = vpop.f32.mrb[3].mxu0  ;;  %v1485_v39 = vadd.f32 %v1484_v36, %v1483_v32  ;;  %v1486_v40 = vpop.f32.mrb[2].mxu1  ;;  %v967_v32 = vld [vmem:[%s2088_s7 + $0x78] sm:$0xff] }
  0xfa   :  { %v653_v38 = vadd.f32 %v1463_v34, %v1352_v30  ;;  %v1487_v42 = vpop.f32.mrb[3].mxu1  ;;  %v966_v30 = vld [vmem:[%s2088_s7 + $0x70] sm:$0xff]  ;;  %v1436_v37 = vcombine.high %v963_v31, %v967_v32  ;;  %s1340_s7 = sshll.u32 %s1687_s6, 4  ;;  %s1341_s7 = int_to_ptr.vmem [resolvable:$true] %s1340_s7 }
  0xfb   :  { %v1434_v36 = vcombine.high %v962_v29, %v966_v30  ;;  %s1634_s0 = scalar_lea.vmem %s1341_s7, 32  ;;  %p1639_p1 = scmp.lt.s32.totalorder %s1341_s7, %s1341_s7 }
  0xfc   :  { %v693_v43 = vadd.f32 %v1485_v39, %v653_v38  ;;  %v1433_v38 = vcombine.low %v962_v29, %v966_v30  ;;  %v1435_v39 = vcombine.low %v963_v31, %v967_v32  ;;  %p1635_p0 = scmp.ne.s32.totalorder %s1341_s7, %s1634_s0  ;;  %p1640_p2 = scmp.lt.s32.totalorder %s1634_s0, %s1634_s0 }
  0xfe   :  { %p1641_p3 = por %p1640_p2, %p1639_p1 }
 0x100   :  { %p1642_p4 = pnand %p1641_p3, %p1635_p0 }
 0x116   :  { %v1505_v44 = vpop.f32.mrb[4].mxu0 }
 0x117   :  { %v1506_v45 = vpop.f32.mrb[5].mxu0 }
 0x118   :  { %v1527_v46 = vpop.f32.mrb[4].mxu1  ;;  %v1507_v47 = vadd.f32 %v1506_v45, %v1505_v44  ;;  %v1508_v48 = vpop.f32.mrb[6].mxu0 }
 0x119   :  { %v1528_v49 = vpop.f32.mrb[5].mxu1  ;;  %v1509_v50 = vpop.f32.mrb[7].mxu0 }
 0x11a   :  { %v733_v51 = vadd.f32 %v1507_v47, %v693_v43  ;;  %v1529_v52 = vadd.f32 %v1528_v49, %v1527_v46  ;;  %v1530_v53 = vpop.f32.mrb[6].mxu1 }
 0x11b   :  { %v1531_v54 = vpop.f32.mrb[7].mxu1 }
 0x11c   :  { %v773_v55 = vadd.f32 %v1529_v52, %v733_v51 }
 0x11e   :  { %v778_v56 = vmax.f32 %v773_v55, 0.0 }
 0x120   :  { %1549 = vmatmul.mubr.msk.f32.vlgmr.msra.gmra.mrb[8].mxu0 %vm790_vm1, %v778_v56 }
 0x121   :  { %1094 = vmatpush1.bf16.msra.mxu0 %v1421_v60  ;;  %1125 = vmatprep.mubr.bf16.mxu0 %v1686_v22 }
 0x122   :  { %1095 = vmatprep.subr.bf16.mxu0 %v1430_v11 }
 0x125   :  { %1096 = vmatpush1.bf16.msra.mxu0 %v1429_v13 }
 0x126   :  { %1175 = vmatprep.subr.bf16.mxu0 %v1426_v20 }
 0x1f3   :  { %v860_v2 = vpop.f32.mrb[8].mxu0 }
 0x1f4   :  { %v861_v4 = vadd.f32 %v1417_v1, %v860_v2  ;;  %v1550_v5 = vpop.f32.mrb[9].mxu0 }
 0x1f6   :  { %v866_v6 = vmul.f32 %v865_v3, %v861_v4  ;;  %864 = vst [vmem:[#allocation4] sm:$0x3] %v861_v4 }
 0x1f8   :  { %v867_v7 = vadd.f32 %v866_v6, %v861_v4 }
 0x1fa   :  { %1554 = vmatmul.mubr.msk.f32.vlgmr.msra.gmra.mrb[8].mxu1 %vm876_vm2, %v867_v7 }
 0x1fb   :  { %1135 = vmatpush1.bf16.msra.mxu1 %v1423_v63  ;;  %1166 = vmatprep.mubr.bf16.mxu1 %v1686_v22 }
 0x1fc   :  { %1136 = vmatprep.subr.bf16.mxu1 %v1432_v15 }
 0x1ff   :  { %1137 = vmatpush1.bf16.msra.mxu1 %v1431_v14 }
 0x200   :  { %1216 = vmatprep.subr.bf16.mxu1 %v1428_v24 }
 0x2cd   :  { %v946_v26 = vpop.f32.mrb[8].mxu1 }
 0x2ce   :  { %v947_v27 = vadd.f32 %v1419_v25, %v946_v26  ;;  %v1555_v28 = vpop.f32.mrb[9].mxu1 }
 0x2d0   :  { %v950_v34 = vmax.f32 %v947_v27, 0.0 }
 0x2d2   :  { %v951_v35 = vpack.c.bf16 %v950_v34, %v950_v34 }
 0x2d4   :  { %1437 = vmatmul.mubr.msk.bf16.vlgmr.msra.gmra.mrb[12].mxu0 %vm790_vm1, %v951_v35  ;;  %1438 = vmatmul.mubr.msk.bf16.vlgmr.msra.gmra.mrb[12].mxu1 %vm790_vm1, %v951_v35 }
 0x2d5   :  { %1176 = vmatpush1.bf16.msra.mxu0 %v1425_v19  ;;  %1217 = vmatpush1.bf16.msra.mxu1 %v1427_v23 }
 0x2d6   :  { %1177 = vmatprep.subr.bf16.mxu0 %v1434_v36  ;;  %1218 = vmatprep.subr.bf16.mxu1 %v1436_v37 }
 0x2d7   :  { %1207 = vmatprep.mubr.bf16.mxu0 %v1686_v22  ;;  %1248 = vmatprep.mubr.bf16.mxu1 %v1686_v22 }
 0x2d9   :  { %1178 = vmatpush1.bf16.msra.mxu0 %v1433_v38  ;;  %1219 = vmatpush1.bf16.msra.mxu1 %v1435_v39 }
 0x2dc   :  { %1439 = vmatmul.mubr.msk.bf16.vlgmr.msra.gmra.mrb[16].mxu0 %vm790_vm1, %v951_v35  ;;  %1440 = vmatmul.mubr.msk.bf16.vlgmr.msra.gmra.mrb[16].mxu1 %vm790_vm1, %v951_v35 }
 0x2dd   :  { %1645 = shalt.err (!%p1642_p4)
}
 0x2de   :  { %s1646_s13 = scalar_lea.hbm %s2092_s11, 32 }
 0x2df   :  { %p1647_p5 = scmp.ne.s32.totalorder %s2092_s11, %s1646_s13  ;;  %p1650_p6 = scmp.lt.u32.totalorder %s1646_s13, %s2092_s11 }
 0x2e1   :  { %p1652_p7 = pnand %p1650_p6, %p1647_p5 }
 0x2e3   :  { %1655 = shalt.err (!%p1652_p7)
}
 0x2e4   :  { %1343 = dma.vmem_to_hbm [thread:$0]  %s1341_s7, 32, %s2092_s11, [#allocation5]   ;;  %v972_v40 = vsub.s32 0, %v1845_v33  ;;  %v980_v42 = vsub.s32 2, %v1845_v33  ;;  %v968_v43 = vld [vmem:[%s2089_s8] sm:$0xff]  ;;  %v976_v44 = vsub.s32 1, %v1845_v33 }
 0x2e5   :  { %v984_v45 = vsub.s32 3, %v1845_v33  ;;  %v988_v56 = vsub.s32 4, %v1845_v33  ;;  %v996_v57 = vsub.s32 6, %v1845_v33  ;;  %v992_v62 = vsub.s32 5, %v1845_v33  ;;  %s1688_s8 = smov [#allocation2]  }
 0x2e6   :  { %v973_v46 = vrot.slane %v968_v43, %v972_v40  ;;  %v981_v47 = vrot.slane %v968_v43, %v980_v42  ;;  %v977_v48 = vrot.slane %v968_v43, %v976_v44  ;;  %v1000_v63 = vsub.s32 7, %v1845_v33  ;;  %s1330_s11 = sshll.u32 %s1688_s8, 4  ;;  %s1331_s11 = int_to_ptr.vmem [resolvable:$true] %s1330_s11 }
 0x2e7   :  { %v985_v49 = vrot.slane %v968_v43, %v984_v45  ;;  %v989_v4 = vrot.slane %v968_v43, %v988_v56  ;;  %v997_v5 = vrot.slane %v968_v43, %v996_v57  ;;  %v993_v8 = vrot.slane %v968_v43, %v992_v62  ;;  %s1656_s19 = scalar_lea.vmem %s1331_s11, 128  ;;  %p1661_p9 = scmp.lt.s32.totalorder %s1331_s11, %s1331_s11 }
 0x2e8   :  { %v1001_v9 = vrot.slane %v968_v43, %v1000_v63  ;;  %p1657_p8 = scmp.ne.s32.totalorder %s1331_s11, %s1656_s19  ;;  %p1662_p10 = scmp.lt.s32.totalorder %s1656_s19, %s1656_s19 }
 0x2ea   :  { %p1663_p11 = por %p1662_p10, %p1661_p9 }
 0x2ec   :  { %p1664_p12 = pnand %p1663_p11, %p1657_p8 }
 0x3a7   :  { %v1127_v50 = vpop.f32.mrb[12].mxu0  ;;  %v1168_v51 = vpop.f32.mrb[12].mxu1 }
 0x3a8   :  { %v1128_v52 = vadd.f32 %v1127_v50, %v973_v46  ;;  %v1169_v53 = vadd.f32 %v1168_v51, %v981_v47  ;;  %v1129_v54 = vpop.f32.mrb[13].mxu0  ;;  %v1170_v55 = vpop.f32.mrb[13].mxu1 }
 0x3a9   :  { %v1130_v58 = vadd.f32 %v1129_v54, %v977_v48  ;;  %v1171_v59 = vadd.f32 %v1170_v55, %v985_v49  ;;  %v1131_v60 = vpop.f32.mrb[14].mxu0  ;;  %v1172_v61 = vpop.f32.mrb[14].mxu1 }
 0x3aa   :  { %v1132_v0 = vpop.f32.mrb[15].mxu0  ;;  %v1173_v1 = vpop.f32.mrb[15].mxu1 }
 0x3ab   :  { %v1441_v2 = vpack.c.bf16 %v1130_v58, %v1128_v52  ;;  %v1442_v3 = vpack.c.bf16 %v1171_v59, %v1169_v53 }
 0x3ad   :  { %v1283_v6 = vrot.slane %v1441_v2, %v1857_v41  ;;  %v1290_v7 = vrot.slane %v1442_v3, %v1857_v41 }
 0x3af   :  { %v1209_v10 = vpop.f32.mrb[16].mxu0  ;;  %v1250_v11 = vpop.f32.mrb[16].mxu1  ;;  %v1305_v12 = vcombine.low %v1283_v6, %v1290_v7 }
 0x3b0   :  { %v1210_v13 = vadd.f32 %v1209_v10, %v989_v4  ;;  %v1251_v14 = vadd.f32 %v1250_v11, %v997_v5  ;;  %v1211_v15 = vpop.f32.mrb[17].mxu0  ;;  %v1252_v16 = vpop.f32.mrb[17].mxu1 }
 0x3b1   :  { %v1212_v33 = vadd.f32 %v1211_v15, %v993_v8  ;;  %v1253_v17 = vadd.f32 %v1252_v16, %v1001_v9  ;;  %v1213_v18 = vpop.f32.mrb[18].mxu0  ;;  %v1254_v19 = vpop.f32.mrb[18].mxu1  ;;  %v1313_v27 = vrot.slane %v1305_v12, %v1857_v41 }
 0x3b2   :  { %v1214_v20 = vpop.f32.mrb[19].mxu0  ;;  %v1255_v21 = vpop.f32.mrb[19].mxu1 }
 0x3b3   :  { %v1443_v22 = vpack.c.bf16 %v1212_v33, %v1210_v13  ;;  %v1444_v23 = vpack.c.bf16 %v1253_v17, %v1251_v14 }
 0x3b5   :  { %v1297_v24 = vrot.slane %v1443_v22, %v1857_v41  ;;  %v1304_v25 = vrot.slane %v1444_v23, %v1857_v41 }
 0x3b7   :  { %v1306_v26 = vcombine.low %v1297_v24, %v1304_v25 }
 0x3b9   :  { %v1320_v28 = vrot.slane %v1306_v26, %v1857_v41 }
 0x3bb   :  { %v1321_v29 = vcombine.low %v1313_v27, %v1320_v28 }
 0x3bd   :  { %1323 = vst [vmem:[#allocation2] sm:$0xff] %v1321_v29 }
 0x3be   :  { %1667 = shalt.err (!%p1664_p12)
}
 0x3bf   :  { %s1668_s3 = scalar_lea.hbm %s2091_s10, 128 }
 0x3c0   :  { %p1669_p13 = scmp.ne.s32.totalorder %s2091_s10, %s1668_s3  ;;  %p1672_p0 = scmp.lt.u32.totalorder %s1668_s3, %s2091_s10 }
 0x3c2   :  { %p1674_p1 = pnand %p1672_p0, %p1669_p13 }
 0x3c4   :  { %1677 = shalt.err (!%p1674_p1)
}
 0x3c5   :  { %1333 = dma.vmem_to_hbm [thread:$0]  %s1331_s11, 128, %s2091_s10, [#allocation3]  }
 0x3c6   :  { %1678 = dma.done.wait [#allocation3], 128  }
 0x3c7   :  { %1679 = vsyncadd [#allocation3], 4294967168 }
 0x3c8   :  { %1680 = dma.done.wait [#allocation5], 32  }
 0x3c9   :  { %1681 = vsyncadd [#allocation5], 4294967264 }
 0x3ca   :  { %1350 = vsyncpa [#allocation3], 1 }
 0x3cb   :  { %1351 = vsyncpa [#allocation5], 1 }

</bundles_post_ra>
